<compile_context>
chip_gen: v7x
topology: tpu7x:2x2x1
jax: 0.10.0
libtpu: 0.0.40
codegen_flags: <defaults>
</compile_context>

<pallas_src>
import jax
import jax.numpy as jnp
from jax.experimental import pallas as pl
from jax.experimental.pallas import tpu as pltpu

INPUT_DIM = 128
HID1 = 64
HID2 = 32
OUTPUT_DIM = 3
OUT_PAD = 8            # pad fc3 to 8 cols: 32-byte contiguous rows for the writeback DMA
MAX_BATCH_TILE = 2048  # bf16 x tile + f32 intermediates stay ~3 MiB << scoped VMEM limit


def _round_up(x, m):
    return ((x + m - 1) // m) * m


def _choose_batch_tile(B):
    """Large, 8-aligned batch tile; keep >= 2 grid tiles when B allows (v7x megacore)."""
    if B <= 8:
        return 8
    half = _round_up(pl.cdiv(B, 2), 8)
    return min(MAX_BATCH_TILE, half)


def _mlp_kernel(x_ref, w1_ref, b1_ref, w2_ref, b2_ref, w3_ref, b3_ref, o_ref):
    # fc1 + ReLU  (bf16 matmul, f32 accumulate, f32 elementwise)
    h1 = jnp.dot(x_ref[...], w1_ref[...], preferred_element_type=jnp.float32)
    h1 = jnp.maximum(h1 + b1_ref[...], 0.0)
    # fc2 + ReLU
    h2 = jnp.dot(h1.astype(jnp.bfloat16), w2_ref[...], preferred_element_type=jnp.float32)
    h2 = jnp.maximum(h2 + b2_ref[...], 0.0)
    # fc3 (no activation); w3/b3 zero-padded to OUT_PAD columns
    out = jnp.dot(h2.astype(jnp.bfloat16), w3_ref[...], preferred_element_type=jnp.float32)
    o_ref[...] = (out + b3_ref[...]).astype(o_ref.dtype)


def pose_regression_forward(x, params, *, batch_tile=None):
    """x: [B, INPUT_DIM] float32. Returns [B, OUTPUT_DIM] float32."""
    w1, b1, w2, b2, w3, b3 = params
    B = x.shape[0]

    bt = batch_tile if batch_tile is not None else _choose_batch_tile(B)
    bt = max(8, _round_up(bt, 8))
    n_tiles = pl.cdiv(B, bt)
    B_pad = n_tiles * bt

    # bf16 input / weight streams; biases stay f32. fc3 padded to OUT_PAD output columns.
    x_in = x.astype(jnp.bfloat16)
    if B_pad != B:
        x_in = jnp.pad(x_in, ((0, B_pad - B), (0, 0)))
    w1b = w1.astype(jnp.bfloat16)
    w2b = w2.astype(jnp.bfloat16)
    w3b = jnp.pad(w3, ((0, 0), (0, OUT_PAD - OUTPUT_DIM))).astype(jnp.bfloat16)
    b3p = jnp.pad(b3, ((0, 0), (0, OUT_PAD - OUTPUT_DIM)))

    # Weights / biases are tiny -> same full block for every batch tile (stay VMEM-resident).
    full = lambda shape: pl.BlockSpec(shape, lambda i: (0,) * len(shape))

    flops = 2 * B_pad * (INPUT_DIM * HID1 + HID1 * HID2 + HID2 * OUT_PAD)
    bytes_accessed = (
        x_in.size * 2                                   # bf16 activations in
        + (w1b.size + w2b.size + w3b.size) * 2          # bf16 weights
        + (b1.size + b2.size + b3p.size) * 4            # f32 biases
        + B_pad * OUT_PAD * 4                           # f32 output
    )

    out_padded = pl.pallas_call(
        _mlp_kernel,
        out_shape=jax.ShapeDtypeStruct((B_pad, OUT_PAD), jnp.float32),
        grid_spec=pltpu.PrefetchScalarGridSpec(
            num_scalar_prefetch=0,
            grid=(n_tiles,),
            in_specs=[
                pl.BlockSpec((bt, INPUT_DIM), lambda i: (i, 0)),   # x tile (bf16)
                full(w1b.shape), full(b1.shape),
                full(w2b.shape), full(b2.shape),
                full(w3b.shape), full(b3p.shape),
            ],
            out_specs=pl.BlockSpec((bt, OUT_PAD), lambda i: (i, 0)),
        ),
        compiler_params=pltpu.CompilerParams(
            dimension_semantics=("parallel",),
        ),
        cost_estimate=pl.CostEstimate(
            flops=flops, transcendentals=0, bytes_accessed=bytes_accessed),
    )(x_in, w1b, b1, w2b, b2, w3b, b3p)

    return out_padded[:B, :OUTPUT_DIM]


def init_params(key):
    """Deterministic init mirroring nn.Linear shapes (stored transposed: [in, out])."""
    k1, k2, k3, k4, k5, k6 = jax.random.split(key, 6)

    def lin(kw, kb, fan_in, fan_out):
        # Kaiming-uniform-ish bound like PyTorch's default Linear init.
        bound = 1.0 / jnp.sqrt(fan_in)
        w = jax.random.uniform(kw, (fan_in, fan_out), jnp.float32, -bound, bound)
        b = jax.random.uniform(kb, (1, fan_out), jnp.float32, -bound, bound)
        return w, b

    w1, b1 = lin(k1, k2, INPUT_DIM, HID1)
    w2, b2 = lin(k3, k4, HID1, HID2)
    w3, b3 = lin(k5, k6, HID2, OUTPUT_DIM)
    return (w1, b1, w2, b2, w3, b3)


def reference_forward(x, params):
    w1, b1, w2, b2, w3, b3 = params
    h1 = jnp.maximum(x @ w1 + b1, 0.0)
    h2 = jnp.maximum(h1 @ w2 + b2, 0.0)
    return h2 @ w3 + b3


if __name__ == "__main__":
    key = jax.random.PRNGKey(0)
    kx, kx2, kp = jax.random.split(key, 3)
    params = init_params(kp)

    # Small example batch (single tile path).
    B = 8
    x = jax.random.normal(kx, (B, INPUT_DIM), dtype=jnp.float32)
    out = jax.block_until_ready(pose_regression_forward(x, params))
    ref = reference_forward(x, params)
    assert out.shape == (B, OUTPUT_DIM)
    # bf16 matmul / f32 accumulate vs. f32 reference -> loosened tolerance.
    assert jnp.allclose(out, ref, atol=3e-2, rtol=3e-2), "mismatch vs reference (B=8)"

    # Ragged batch (exercises cdiv + zero-padding and the multi-tile / megacore path).
    B2 = 20
    x2 = jax.random.normal(kx2, (B2, INPUT_DIM), dtype=jnp.float32)
    out2 = jax.block_until_ready(pose_regression_forward(x2, params))
    ref2 = reference_forward(x2, params)
    assert out2.shape == (B2, OUTPUT_DIM)
    assert jnp.allclose(out2, ref2, atol=3e-2, rtol=3e-2), "mismatch vs reference (B=20)"

    print("KERNEL_OK")
</pallas_src>

<mosaic_0001>
module attributes {stable_mosaic.version = 11 : i64} {
  func.func @_mlp_kernel(%arg0: i32, %arg1: memref<8x128xbf16, #tpu.memory_space<vmem>>, %arg2: memref<128x64xbf16, #tpu.memory_space<vmem>>, %arg3: memref<1x64xf32, #tpu.memory_space<vmem>>, %arg4: memref<64x32xbf16, #tpu.memory_space<vmem>>, %arg5: memref<1x32xf32, #tpu.memory_space<vmem>>, %arg6: memref<32x8xbf16, #tpu.memory_space<vmem>>, %arg7: memref<1x8xf32, #tpu.memory_space<vmem>>, %arg8: memref<8x8xf32, #tpu.memory_space<vmem>>) attributes {dimension_semantics = [#tpu.dimension_semantics<parallel>], iteration_bounds = array<i64: 1>, scalar_prefetch = 0 : i64, scratch_operands = 0 : i64, tpu.core_type = #tpu.core_type<tc>, window_params = [{transform_indices = @transform_0, window_bounds = array<i64: 8, 128>}, {pipeline_mode = #tpu.pipeline_mode<synchronous>, transform_indices = @transform_1, window_bounds = array<i64: 128, 64>}, {pipeline_mode = #tpu.pipeline_mode<synchronous>, transform_indices = @transform_2, window_bounds = array<i64: 1, 64>}, {pipeline_mode = #tpu.pipeline_mode<synchronous>, transform_indices = @transform_3, window_bounds = array<i64: 64, 32>}, {pipeline_mode = #tpu.pipeline_mode<synchronous>, transform_indices = @transform_4, window_bounds = array<i64: 1, 32>}, {pipeline_mode = #tpu.pipeline_mode<synchronous>, transform_indices = @transform_5, window_bounds = array<i64: 32, 8>}, {pipeline_mode = #tpu.pipeline_mode<synchronous>, transform_indices = @transform_6, window_bounds = array<i64: 1, 8>}, {transform_indices = @transform_7, window_bounds = array<i64: 8, 8>}]} {
    %c0 = arith.constant 0 : index
    %c0_0 = arith.constant 0 : index
    %0 = vector.load %arg1[%c0, %c0_0] : memref<8x128xbf16, #tpu.memory_space<vmem>>, vector<8x128xbf16>
    %c0_1 = arith.constant 0 : index
    %c0_2 = arith.constant 0 : index
    %1 = vector.load %arg2[%c0_1, %c0_2] : memref<128x64xbf16, #tpu.memory_space<vmem>>, vector<128x64xbf16>
    %cst = arith.constant dense<0.000000e+00> : vector<8x64xf32>
    %2 = tpu.matmul %0, %1, %cst {dimension_numbers = #tpu.dot_dimension_numbers<[1], [0], [0], [1], [0, 0, 1, 1], [], []>} : vector<8x128xbf16>, vector<128x64xbf16>, vector<8x64xf32> -> vector<8x64xf32>
    %c0_3 = arith.constant 0 : index
    %c0_4 = arith.constant 0 : index
    %3 = vector.load %arg3[%c0_3, %c0_4] : memref<1x64xf32, #tpu.memory_space<vmem>>, vector<1x64xf32>
    %4 = vector.broadcast %3 : vector<1x64xf32> to vector<8x64xf32>
    %5 = arith.addf %2, %4 : vector<8x64xf32>
    %cst_5 = arith.constant 0.000000e+00 : f32
    %6 = vector.broadcast %cst_5 : f32 to vector<8x64xf32>
    %7 = arith.maximumf %5, %6 : vector<8x64xf32>
    %8 = arith.truncf %7 : vector<8x64xf32> to vector<8x64xbf16>
    %c0_6 = arith.constant 0 : index
    %c0_7 = arith.constant 0 : index
    %9 = vector.load %arg4[%c0_6, %c0_7] : memref<64x32xbf16, #tpu.memory_space<vmem>>, vector<64x32xbf16>
    %cst_8 = arith.constant dense<0.000000e+00> : vector<8x32xf32>
    %10 = tpu.matmul %8, %9, %cst_8 {dimension_numbers = #tpu.dot_dimension_numbers<[1], [0], [0], [1], [0, 0, 1, 1], [], []>} : vector<8x64xbf16>, vector<64x32xbf16>, vector<8x32xf32> -> vector<8x32xf32>
    %c0_9 = arith.constant 0 : index
    %c0_10 = arith.constant 0 : index
    %11 = vector.load %arg5[%c0_9, %c0_10] : memref<1x32xf32, #tpu.memory_space<vmem>>, vector<1x32xf32>
    %12 = vector.broadcast %11 : vector<1x32xf32> to vector<8x32xf32>
    %13 = arith.addf %10, %12 : vector<8x32xf32>
    %cst_11 = arith.constant 0.000000e+00 : f32
    %14 = vector.broadcast %cst_11 : f32 to vector<8x32xf32>
    %15 = arith.maximumf %13, %14 : vector<8x32xf32>
    %16 = arith.truncf %15 : vector<8x32xf32> to vector<8x32xbf16>
    %c0_12 = arith.constant 0 : index
    %c0_13 = arith.constant 0 : index
    %17 = vector.load %arg6[%c0_12, %c0_13] : memref<32x8xbf16, #tpu.memory_space<vmem>>, vector<32x8xbf16>
    %cst_14 = arith.constant dense<0.000000e+00> : vector<8x8xf32>
    %18 = tpu.matmul %16, %17, %cst_14 {dimension_numbers = #tpu.dot_dimension_numbers<[1], [0], [0], [1], [0, 0, 1, 1], [], []>} : vector<8x32xbf16>, vector<32x8xbf16>, vector<8x8xf32> -> vector<8x8xf32>
    %c0_15 = arith.constant 0 : index
    %c0_16 = arith.constant 0 : index
    %19 = vector.load %arg7[%c0_15, %c0_16] : memref<1x8xf32, #tpu.memory_space<vmem>>, vector<1x8xf32>
    %20 = vector.broadcast %19 : vector<1x8xf32> to vector<8x8xf32>
    %21 = arith.addf %18, %20 : vector<8x8xf32>
    %c0_17 = arith.constant 0 : index
    %c0_18 = arith.constant 0 : index
    %22 = vector.load %arg8[%c0_17, %c0_18] : memref<8x8xf32, #tpu.memory_space<vmem>>, vector<8x8xf32>
    tpu.vector_store %arg8[%c0_17, %c0_18], %21 {strides = array<i32>} : memref<8x8xf32, #tpu.memory_space<vmem>>, vector<8x8xf32>,
    return
  }
  func.func @transform_0(%arg0: i32) -> (i32, i32) {
    %c0_i32 = arith.constant 0 : i32
    %c0_i32_0 = arith.constant 0 : i32
    return %arg0, %c0_i32 : i32, i32
  }
  func.func @transform_1(%arg0: i32) -> (i32, i32) {
    %c0_i32 = arith.constant 0 : i32
    %c0_i32_0 = arith.constant 0 : i32
    %c0_i32_1 = arith.constant 0 : i32
    return %c0_i32, %c0_i32_0 : i32, i32
  }
  func.func @transform_2(%arg0: i32) -> (i32, i32) {
    %c0_i32 = arith.constant 0 : i32
    %c0_i32_0 = arith.constant 0 : i32
    %c0_i32_1 = arith.constant 0 : i32
    return %c0_i32, %c0_i32_0 : i32, i32
  }
  func.func @transform_3(%arg0: i32) -> (i32, i32) {
    %c0_i32 = arith.constant 0 : i32
    %c0_i32_0 = arith.constant 0 : i32
    %c0_i32_1 = arith.constant 0 : i32
    return %c0_i32, %c0_i32_0 : i32, i32
  }
  func.func @transform_4(%arg0: i32) -> (i32, i32) {
    %c0_i32 = arith.constant 0 : i32
    %c0_i32_0 = arith.constant 0 : i32
    %c0_i32_1 = arith.constant 0 : i32
    return %c0_i32, %c0_i32_0 : i32, i32
  }
  func.func @transform_5(%arg0: i32) -> (i32, i32) {
    %c0_i32 = arith.constant 0 : i32
    %c0_i32_0 = arith.constant 0 : i32
    %c0_i32_1 = arith.constant 0 : i32
    return %c0_i32, %c0_i32_0 : i32, i32
  }
  func.func @transform_6(%arg0: i32) -> (i32, i32) {
    %c0_i32 = arith.constant 0 : i32
    %c0_i32_0 = arith.constant 0 : i32
    %c0_i32_1 = arith.constant 0 : i32
    return %c0_i32, %c0_i32_0 : i32, i32
  }
  func.func @transform_7(%arg0: i32) -> (i32, i32) {
    %c0_i32 = arith.constant 0 : i32
    %c0_i32_0 = arith.constant 0 : i32
    return %arg0, %c0_i32 : i32, i32
  }
}

</mosaic_0001>

<bundles_post_ra>
// kernel: tpu_custom_call.1
= control target key start
LH: loop header
LB: loop body
LE: loop exit
PB: predicated region body
PF: predicated region fallthrough
CT: control target
= control target key end

     0   :  { %v427_v1 = vmov 0.0   ;;  %vm428_vm0 = vmmov 0   ;;  %s539_s0 = inlined_call_operand.vmem [shape: bf16[8,128], index: 0, kind: input, shape index: {}]   ;;  %s540_s1 = inlined_call_operand.vmem [shape: bf16[128,64], index: 1, kind: input, shape index: {}]   ;;  %s541_s2 = inlined_call_operand.vmem [shape: f32[1,64], index: 2, kind: input, shape index: {}]   ;;  %s542_s3 = inlined_call_operand.vmem [shape: bf16[64,32], index: 3, kind: input, shape index: {}]   ;;  %s543_s4 = inlined_call_operand.vmem [shape: f32[1,32], index: 4, kind: input, shape index: {}]   ;;  %s544_s5 = inlined_call_operand.vmem [shape: bf16[32,8], index: 5, kind: input, shape index: {}]   ;;  %s545_s6 = inlined_call_operand.vmem [shape: f32[1,8], index: 6, kind: input, shape index: {}]   ;;  %s546_s7 = inlined_call_operand.hbm [shape: f32[8,8], index: 7, kind: output, shape index: {}]  }
   0x1   :  { %v389_v0 = vld [vmem:[%s540_s1] sm:$0xff]   ;;  %346 = vmatprep.subr.bf16.mxu0 %v427_v1  ;;  %366 = vmatprep.subr.bf16.mxu1 %v427_v1  ;;  %v390_v2 = vld [vmem:[%s540_s1 + $0x8] sm:$0xff]   ;;  %v391_v3 = vld [vmem:[%s540_s1 + $0x10] sm:$0xff]  }
   0x2   :  { %347 = vmatpush3.bf16.msra.mxu0 %v389_v0  ;;  %362 = vmatprep.mubr.msk.bf16.mxu0 %vm428_vm0, %v427_v1  ;;  %v397_v4 = vld [vmem:[%s542_s3] sm:$0xff]   ;;  %v392_v5 = vld [vmem:[%s540_s1 + $0x18] sm:$0xff]   ;;  %v398_v6 = vld [vmem:[%s542_s3 + $0x8] sm:$0xff]  }
   0x3   :  { %348 = vmatprep.subr.bf16.mxu0 %v427_v1  ;;  %374 = vmatprep.mubr.msk.bf16.mxu1 %vm428_vm0, %v427_v1 }
   0x4   :  { %367 = vmatpush3.bf16.msra.mxu1 %v397_v4 }
   0x5   :  { %368 = vmatprep.subr.bf16.mxu1 %v427_v1 }
   0x6   :  { %349 = vmatpush3.bf16.msra.mxu0 %v390_v2 }
   0x7   :  { %350 = vmatprep.subr.bf16.mxu0 %v427_v1 }
   0xa   :  { %351 = vmatpush3.bf16.msra.mxu0 %v391_v3 }
   0xb   :  { %352 = vmatprep.subr.bf16.mxu0 %v427_v1 }
   0xc   :  { %12 = vsyncpa [#allocation3], 0  ;;  %v393_v7 = vld [vmem:[%s540_s1 + $0x20] sm:$0xff]   ;;  %369 = vmatpush3.bf16.msra.mxu1 %v398_v6  ;;  %v394_v8 = vld [vmem:[%s540_s1 + $0x28] sm:$0xff]   ;;  %vm181_vm1 = vcmask 523264   ;;  %vm250_vm2 = vcmask 261120  }
   0xd   :  { %370 = vmatprep.subr.bf16.mxu1 %v427_v1  ;;  %v395_v9 = vld [vmem:[%s540_s1 + $0x30] sm:$0xff]   ;;  %v396_v10 = vld [vmem:[%s540_s1 + $0x38] sm:$0xff]   ;;  %v28_v11 = vld [vmem:[%s539_s0] sm:$0xf]  ;;  %s429_s10 = smov [#allocation2]   ;;  %vm294_vm3 = vcmask 64512  }
   0xe   :  { %353 = vmatpush3.bf16.msra.mxu0 %v392_v5  ;;  %v399_v12 = vld [vmem:[%s542_s3 + $0x10] sm:$0xff]   ;;  %v400_v13 = vld [vmem:[%s542_s3 + $0x18] sm:$0xff]   ;;  %v310_v14 = vld [vmem:[%s541_s2] ss:$0 sm:$0xff] }
   0xf   :  { %354 = vmatprep.subr.bf16.mxu0 %v427_v1  ;;  %v401_v21 = vld [vmem:[%s544_s5] sm:$0xff]   ;;  %v402_v23 = vld [vmem:[%s544_s5 + $0x8] sm:$0xff]   ;;  %s302_s5 = sshll.u32 %s429_s10, 4  ;;  %s303_s5 = int_to_ptr.vmem [resolvable:$true] %s302_s5 }
  0x10   :  { %371 = vmatpush3.bf16.msra.mxu1 %v399_v12  ;;  %v319_v24 = vld [vmem:[%s543_s4] ss:$0 sm:$0xff]  ;;  %s403_s4 = scalar_lea.vmem %s303_s5, 128  ;;  %p408_p1 = scmp.lt.s32.totalorder %s303_s5, %s303_s5 }
  0x11   :  { %372 = vmatprep.subr.bf16.mxu1 %v427_v1  ;;  %v325_v32 = vld [vmem:[%s545_s6] ss:$0 sm:$0xff]  ;;  %p404_p0 = scmp.ne.s32.totalorder %s303_s5, %s403_s4  ;;  %p409_p2 = scmp.lt.s32.totalorder %s403_s4, %s403_s4 }
  0x12   :  { %355 = vmatpush3.bf16.msra.mxu0 %v393_v7 }
  0x13   :  { %356 = vmatprep.subr.bf16.mxu0 %v427_v1  ;;  %p410_p3 = por %p409_p2, %p408_p1 }
  0x14   :  { %373 = vmatpush3.bf16.msra.mxu1 %v400_v13 }
  0x15   :  { %378 = vmatprep.subr.bf16.mxu1 %v427_v1  ;;  %p411_p4 = pnand %p410_p3, %p404_p0 }
  0x16   :  { %357 = vmatpush3.bf16.msra.mxu0 %v394_v8 }
  0x17   :  { %358 = vmatprep.subr.bf16.mxu0 %v427_v1 }
  0x1a   :  { %359 = vmatpush3.bf16.msra.mxu0 %v395_v9 }
  0x1b   :  { %360 = vmatprep.subr.bf16.mxu0 %v427_v1 }
  0x1e   :  { %361 = vmatpush3.bf16.msra.mxu0 %v396_v10 }
  0x21   :  { %363 = vmatmul.mubr.bf16.vlgmr.msra.gmra.mrb[0].mxu0 %v28_v11 }
  0xf4   :  { %v134_v15 = vpop.f32.mrb[0].mxu0 }
  0xf5   :  { %v135_v16 = vadd.f32 %v310_v14, %v134_v15  ;;  %v364_v17 = vpop.f32.mrb[1].mxu0 }
  0xf6   :  { %v137_v18 = vpop.f32.mrb[2].mxu0 }
  0xf7   :  { %v140_v19 = vmax.f32 %v135_v16, 0.0  ;;  %v365_v20 = vpop.f32.mrb[3].mxu0 }
  0xf9   :  { %v141_v22 = vpack.c.bf16 %v140_v19, %v140_v19 }
  0xfb   :  { %375 = vmatmul.mubr.msk.bf16.vlgmr.msra.gmra.mrb[0].mxu1 %vm181_vm1, %v141_v22 }
  0xfc   :  { %379 = vmatpush3.bf16.msra.mxu1 %v401_v21  ;;  %382 = vmatprep.mubr.msk.bf16.mxu1 %vm428_vm0, %v427_v1 }
  0xfd   :  { %380 = vmatprep.subr.bf16.mxu1 %v427_v1 }
 0x100   :  { %381 = vmatpush3.bf16.msra.mxu1 %v402_v23 }
 0x1ce   :  { %v219_v25 = vpop.f32.mrb[0].mxu1 }
 0x1cf   :  { %v220_v26 = vadd.f32 %v319_v24, %v219_v25  ;;  %v376_v27 = vpop.f32.mrb[1].mxu1 }
 0x1d0   :  { %v222_v28 = vpop.f32.mrb[2].mxu1 }
 0x1d1   :  { %v225_v29 = vmax.f32 %v220_v26, 0.0  ;;  %v377_v30 = vpop.f32.mrb[3].mxu1 }
 0x1d3   :  { %v226_v31 = vpack.c.bf16 %v225_v29, %v225_v29 }
 0x1d5   :  { %383 = vmatmul.mubr.msk.bf16.vlgmr.msra.gmra.mrb[4].mxu1 %vm250_vm2, %v226_v31 }
 0x2a8   :  { %v288_v33 = vpop.f32.mrb[4].mxu1 }
 0x2a9   :  { %v289_v34 = vadd.f32 %v325_v32, %v288_v33  ;;  %v384_v35 = vpop.f32.mrb[5].mxu1 }
 0x2aa   :  { %v291_v36 = vpop.f32.mrb[6].mxu1 }
 0x2ab   :  { %v385_v37 = vpop.f32.mrb[7].mxu1  ;;  %295 = vst.msk [vmem:[#allocation2] sm:$0xff] %vm294_vm3, %v289_v34 }
 0x2ac   :  { %414 = shalt.err (!%p411_p4)
}
 0x2ad   :  { %s415_s6 = scalar_lea.hbm %s546_s7, 128 }
 0x2ae   :  { %p416_p5 = scmp.ne.s32.totalorder %s546_s7, %s415_s6  ;;  %p419_p6 = scmp.lt.u32.totalorder %s415_s6, %s546_s7 }
 0x2b0   :  { %p421_p7 = pnand %p419_p6, %p416_p5 }
 0x2b2   :  { %424 = shalt.err (!%p421_p7)
}
 0x2b3   :  { %305 = dma.vmem_to_hbm [thread:$0]  %s303_s5, 128, %s546_s7, [#allocation3]  }
 0x2b4   :  { %425 = dma.done.wait [#allocation3], 128  }
 0x2b5   :  { %426 = vsyncadd [#allocation3], 4294967168 }
 0x2b6   :  { %309 = vsyncpa [#allocation3], 1 }

</bundles_post_ra>
